<compile_context>
chip_gen: v7x
topology: tpu7x:2x2x1
jax: 0.10.0
libtpu: 0.0.40
codegen_flags: <defaults>
</compile_context>

<pallas_src>
import jax
import jax.numpy as jnp
from jax.experimental import pallas as pl
from jax.experimental.pallas import tpu as pltpu

EPS = 1e-5  # nn.BatchNorm2d default eps


# --------------------------------------------------------------------------
# Pass 1: per-phase matmul (MXU) + per-block BN partial statistics.
#   p_ref   : (K, TM)    bf16   patches (K = 2*2*Cin), TM rows of this phase
#   w_ref   : (Cout, K)  bf16   phase weight slice
#   y_ref   : (Cout, TM) f32    un-normalized conv output (lane-dense)
#   sum_ref : (Cout, 1)  f32    per-block sum over TM
#   sq_ref  : (Cout, 1)  f32    per-block sum of squares over TM
# --------------------------------------------------------------------------
def _matmul_stats_kernel(p_ref, w_ref, y_ref, sum_ref, sq_ref):
    y = jnp.dot(w_ref[...], p_ref[...], preferred_element_type=jnp.float32)
    y_ref[...] = y
    sum_ref[...] = jnp.sum(y, axis=1, keepdims=True)
    sq_ref[...] = jnp.sum(y * y, axis=1, keepdims=True)


# --------------------------------------------------------------------------
# Pass 2: fused BatchNorm affine + ReLU (elementwise, lane-dense tiles).
#   y_ref     : (Cout, TM) f32
#   scale_ref : (Cout, 1)  f32   gamma / sqrt(var + eps)
#   shift_ref : (Cout, 1)  f32   beta - mean * scale
# --------------------------------------------------------------------------
def _bn_relu_kernel(y_ref, scale_ref, shift_ref, o_ref):
    o_ref[...] = jnp.maximum(
        y_ref[...] * scale_ref[...] + shift_ref[...], 0.0
    ).astype(o_ref.dtype)


def _pick_tm(m, k, cout, budget_bytes=8 << 20, tm_cap=2048):
    """Largest multiple-of-128 divisor of m that keeps double-buffered tiles
    under `budget_bytes` (safe for the 16 MiB v5e default scoped VMEM)."""
    # double-buffered bf16 patches + f32 y (pass 1) + f32 in/out (pass 2)
    per_row = 2 * (k * 2) + 2 * (cout * 4) + 2 * (cout * 4)
    cap = max(128, min(tm_cap, budget_bytes // max(per_row, 1)))
    best = None
    d = 128
    while d <= min(m, cap):
        if m % d == 0:
            best = d
        d += 128
    return best if best is not None else m  # fall back to one full block


def up_forward(x, w, gamma, beta):
    """x: (N, Cin, H, W) NCHW f32.  w: (Cin, Cout, 4, 4) PyTorch ConvTranspose2d layout.
    Returns (N, Cout, 2H, 2W) f32 (training-mode BatchNorm, then ReLU)."""
    N, Cin, H, W = x.shape
    Cin_w, Cout, KH, KW = w.shape
    assert Cin == Cin_w and (KH, KW) == (4, 4)
    Hout, Wout = 2 * H, 2 * W
    Mp = N * H * W          # rows per sub-pixel phase
    K = 4 * Cin             # 2x2 taps * Cin

    # ---- sub-pixel decomposition of ConvTranspose2d(4, 2, 1) --------------
    # Output pixel (oy, ox) = (2*qy + py, 2*qx + px); for phase (py, px) the
    # contributing input rows are padded rows {qy+py, qy+py+1} with kernel taps
    # ky = 3 - py - 2*d (d = 0, 1), and analogously for x.
    xpad = jnp.pad(x, ((0, 0), (0, 0), (1, 1), (1, 1)))      # (N,Cin,H+2,W+2)
    p_list, w_list = [], []
    for py in range(2):
        for px in range(2):
            taps, wtaps = [], []
            for d in range(2):
                for e in range(2):
                    taps.append(
                        xpad[:, :, py + d: py + d + H, px + e: px + e + W])
                    wtaps.append(w[:, :, 3 - py - 2 * d, 3 - px - 2 * e])
            t = jnp.stack(taps, axis=0)                       # (4,N,Cin,H,W)
            t = t.transpose(0, 2, 1, 3, 4).reshape(K, Mp)     # (K, Mp)
            p_list.append(t)
            wt = jnp.stack(wtaps, axis=0).reshape(K, Cout)    # (K, Cout)
            w_list.append(wt.T)                               # (Cout, K)
    P = jnp.stack(p_list, axis=0).astype(jnp.bfloat16)        # (4, K, Mp)
    Wm = jnp.stack(w_list, axis=0).astype(jnp.bfloat16)       # (4, Cout, K)

    TM = _pick_tm(Mp, K, Cout)
    nb = Mp // TM
    assert TM * nb == Mp

    # ---- pass 1: matmul + partial BN stats ---------------------------------
    y_flat, psum, psq = pl.pallas_call(
        _matmul_stats_kernel,
        out_shape=(
            jax.ShapeDtypeStruct((4, Cout, Mp), jnp.float32),
            jax.ShapeDtypeStruct((4, nb, Cout, 1), jnp.float32),
            jax.ShapeDtypeStruct((4, nb, Cout, 1), jnp.float32),
        ),
        grid=(4, nb),
        in_specs=[
            pl.BlockSpec((None, K, TM), lambda p, i: (p, 0, i)),
            pl.BlockSpec((None, Cout, K), lambda p, i: (p, 0, 0)),
        ],
        out_specs=(
            pl.BlockSpec((None, Cout, TM), lambda p, i: (p, 0, i)),
            pl.BlockSpec((None, None, Cout, 1), lambda p, i: (p, i, 0, 0)),
            pl.BlockSpec((None, None, Cout, 1), lambda p, i: (p, i, 0, 0)),
        ),
        compiler_params=pltpu.CompilerParams(
            dimension_semantics=("parallel", "parallel")),
        cost_estimate=pl.CostEstimate(
            flops=2 * 4 * Mp * K * Cout,
            transcendentals=0,
            bytes_accessed=P.size * 2 + Wm.size * 2 + 4 * Cout * Mp * 4),
    )(P, Wm)

    # ---- tiny cross-block reduce + BN scale/shift (plain XLA) -------------
    cnt = jnp.float32(4 * Mp)                                 # = N*Hout*Wout
    mean = jnp.sum(psum, axis=(0, 1, 3)) / cnt                # (Cout,)
    var = jnp.maximum(jnp.sum(psq, axis=(0, 1, 3)) / cnt - mean * mean, 0.0)
    inv = jax.lax.rsqrt(var + EPS)
    g = gamma.astype(jnp.float32)
    b = beta.astype(jnp.float32)
    scale = (g * inv).reshape(Cout, 1)
    shift = (b - mean * g * inv).reshape(Cout, 1)

    # ---- pass 2: normalize + affine + ReLU ---------------------------------
    out_t = pl.pallas_call(
        _bn_relu_kernel,
        out_shape=jax.ShapeDtypeStruct((4, Cout, Mp), jnp.float32),
        grid=(4, nb),
        in_specs=[
            pl.BlockSpec((None, Cout, TM), lambda p, i: (p, 0, i)),
            pl.BlockSpec((Cout, 1), lambda p, i: (0, 0)),
            pl.BlockSpec((Cout, 1), lambda p, i: (0, 0)),
        ],
        out_specs=pl.BlockSpec((None, Cout, TM), lambda p, i: (p, 0, i)),
        compiler_params=pltpu.CompilerParams(
            dimension_semantics=("parallel", "parallel")),
    )(y_flat, scale, shift)

    # (phase, Cout, n*H*W) -> (N, Cout, 2H, 2W): oy = 2*qy+py, ox = 2*qx+px
    out = out_t.reshape(2, 2, Cout, N, H, W)
    out = out.transpose(3, 2, 4, 0, 5, 1).reshape(N, Cout, Hout, Wout)
    return out


def _reference(x, w, gamma, beta):
    """Pure-JAX reference: ConvTranspose2d(4,2,1) + train-mode BN + ReLU."""
    wf = jnp.transpose(w[:, :, ::-1, ::-1], (1, 0, 2, 3))     # (Cout,Cin,4,4)
    y = jax.lax.conv_general_dilated(
        x, wf, window_strides=(1, 1), padding=((2, 2), (2, 2)),
        lhs_dilation=(2, 2), rhs_dilation=(1, 1),
        dimension_numbers=("NCHW", "OIHW", "NCHW"))
    mean = jnp.mean(y, axis=(0, 2, 3), keepdims=True)
    var = jnp.mean(jnp.square(y - mean), axis=(0, 2, 3), keepdims=True)
    yh = (y - mean) * jax.lax.rsqrt(var + EPS)
    return jnp.maximum(
        yh * gamma.reshape(1, -1, 1, 1) + beta.reshape(1, -1, 1, 1), 0.0)


if __name__ == "__main__":
    key = jax.random.PRNGKey(0)
    kx, kw, kg, kb = jax.random.split(key, 4)

    # Small shapes consistent with the module: batch=2, in_ch=4, out_ch=8, 16x16.
    N, Cin, Cout, H, W = 2, 4, 8, 16, 16
    x = jax.random.normal(kx, (N, Cin, H, W), dtype=jnp.float32)
    w = 0.1 * jax.random.normal(kw, (Cin, Cout, 4, 4), dtype=jnp.float32)
    gamma = 1.0 + 0.1 * jax.random.normal(kg, (Cout,), dtype=jnp.float32)
    beta = 0.1 * jax.random.normal(kb, (Cout,), dtype=jnp.float32)

    fwd = jax.jit(up_forward)
    out = fwd(x, w, gamma, beta)
    jax.block_until_ready(out)
    assert out.shape == (N, Cout, 2 * H, 2 * W), out.shape

    ref = _reference(x, w, gamma, beta)
    err = float(jnp.max(jnp.abs(out - ref)))
    assert err < 0.1, f"max abs err vs reference: {err}"
    print("KERNEL_OK")
</pallas_src>

<mosaic_0001>
module attributes {stable_mosaic.version = 11 : i64} {
  func.func @_matmul_stats_kernel(%arg0: i32, %arg1: i32, %arg2: memref<1x16x512xbf16, #tpu.memory_space<vmem>>, %arg3: memref<1x8x16xbf16, #tpu.memory_space<vmem>>, %arg4: memref<1x8x512xf32, #tpu.memory_space<vmem>>, %arg5: memref<1x1x8x1xf32, #tpu.memory_space<vmem>>, %arg6: memref<1x1x8x1xf32, #tpu.memory_space<vmem>>) attributes {dimension_semantics = [#tpu.dimension_semantics<parallel>, #tpu.dimension_semantics<parallel>], iteration_bounds = array<i64: 4, 1>, scalar_prefetch = 0 : i64, scratch_operands = 0 : i64, tpu.core_type = #tpu.core_type<tc>, window_params = [{transform_indices = @transform_0, window_bounds = array<i64: 1, 16, 512>}, {transform_indices = @transform_1, window_bounds = array<i64: 1, 8, 16>}, {transform_indices = @transform_2, window_bounds = array<i64: 1, 8, 512>}, {transform_indices = @transform_3, window_bounds = array<i64: 1, 1, 8, 1>}, {transform_indices = @transform_4, window_bounds = array<i64: 1, 1, 8, 1>}]} {
    %c0 = arith.constant 0 : index
    %c0_0 = arith.constant 0 : index
    %c0_1 = arith.constant 0 : index
    %0 = vector.load %arg3[%c0, %c0_0, %c0_1] : memref<1x8x16xbf16, #tpu.memory_space<vmem>>, vector<1x8x16xbf16>
    %1 = vector.shape_cast %0 : vector<1x8x16xbf16> to vector<8x16xbf16>
    %c0_2 = arith.constant 0 : index
    %c0_3 = arith.constant 0 : index
    %c0_4 = arith.constant 0 : index
    %2 = vector.load %arg2[%c0_2, %c0_3, %c0_4] : memref<1x16x512xbf16, #tpu.memory_space<vmem>>, vector<1x16x512xbf16>
    %3 = vector.shape_cast %2 : vector<1x16x512xbf16> to vector<16x512xbf16>
    %cst = arith.constant dense<0.000000e+00> : vector<8x512xf32>
    %4 = tpu.matmul %1, %3, %cst {dimension_numbers = #tpu.dot_dimension_numbers<[1], [0], [0], [1], [0, 0, 1, 1], [], []>} : vector<8x16xbf16>, vector<16x512xbf16>, vector<8x512xf32> -> vector<8x512xf32>
    %c0_5 = arith.constant 0 : index
    %c0_6 = arith.constant 0 : index
    %c0_7 = arith.constant 0 : index
    %5 = vector.load %arg4[%c0_5, %c0_6, %c0_7] : memref<1x8x512xf32, #tpu.memory_space<vmem>>, vector<1x8x512xf32>
    %6 = vector.shape_cast %5 : vector<1x8x512xf32> to vector<8x512xf32>
    %7 = vector.shape_cast %4 : vector<8x512xf32> to vector<1x8x512xf32>
    tpu.vector_store %arg4[%c0_5, %c0_6, %c0_7], %7 {strides = array<i32>} : memref<1x8x512xf32, #tpu.memory_space<vmem>>, vector<1x8x512xf32>,
    %cst_8 = arith.constant dense<0.000000e+00> : vector<8xf32>
    %8 = vector.multi_reduction <add>, %4, %cst_8 [1] : vector<8x512xf32> to vector<8xf32>
    %9 = vector.shape_cast %8 : vector<8xf32> to vector<8x1xf32>
    %c0_9 = arith.constant 0 : index
    %c0_10 = arith.constant 0 : index
    %c0_11 = arith.constant 0 : index
    %c0_12 = arith.constant 0 : index
    %10 = vector.load %arg5[%c0_9, %c0_10, %c0_11, %c0_12] : memref<1x1x8x1xf32, #tpu.memory_space<vmem>>, vector<1x1x8x1xf32>
    %11 = vector.shape_cast %10 : vector<1x1x8x1xf32> to vector<8x1xf32>
    %12 = vector.shape_cast %9 : vector<8x1xf32> to vector<1x1x8x1xf32>
    tpu.vector_store %arg5[%c0_9, %c0_10, %c0_11, %c0_12], %12 {strides = array<i32>} : memref<1x1x8x1xf32, #tpu.memory_space<vmem>>, vector<1x1x8x1xf32>,
    %13 = arith.mulf %4, %4 : vector<8x512xf32>
    %cst_13 = arith.constant dense<0.000000e+00> : vector<8xf32>
    %14 = vector.multi_reduction <add>, %13, %cst_13 [1] : vector<8x512xf32> to vector<8xf32>
    %15 = vector.shape_cast %14 : vector<8xf32> to vector<8x1xf32>
    %c0_14 = arith.constant 0 : index
    %c0_15 = arith.constant 0 : index
    %c0_16 = arith.constant 0 : index
    %c0_17 = arith.constant 0 : index
    %16 = vector.load %arg6[%c0_14, %c0_15, %c0_16, %c0_17] : memref<1x1x8x1xf32, #tpu.memory_space<vmem>>, vector<1x1x8x1xf32>
    %17 = vector.shape_cast %16 : vector<1x1x8x1xf32> to vector<8x1xf32>
    %18 = vector.shape_cast %15 : vector<8x1xf32> to vector<1x1x8x1xf32>
    tpu.vector_store %arg6[%c0_14, %c0_15, %c0_16, %c0_17], %18 {strides = array<i32>} : memref<1x1x8x1xf32, #tpu.memory_space<vmem>>, vector<1x1x8x1xf32>,
    return
  }
  func.func @transform_0(%arg0: i32, %arg1: i32) -> (i32, i32, i32) {
    %c0_i32 = arith.constant 0 : i32
    %c0_i32_0 = arith.constant 0 : i32
    return %arg0, %c0_i32, %arg1 : i32, i32, i32
  }
  func.func @transform_1(%arg0: i32, %arg1: i32) -> (i32, i32, i32) {
    %c0_i32 = arith.constant 0 : i32
    %c0_i32_0 = arith.constant 0 : i32
    %c0_i32_1 = arith.constant 0 : i32
    return %arg0, %c0_i32, %c0_i32_0 : i32, i32, i32
  }
  func.func @transform_2(%arg0: i32, %arg1: i32) -> (i32, i32, i32) {
    %c0_i32 = arith.constant 0 : i32
    %c0_i32_0 = arith.constant 0 : i32
    return %arg0, %c0_i32, %arg1 : i32, i32, i32
  }
  func.func @transform_3(%arg0: i32, %arg1: i32) -> (i32, i32, i32, i32) {
    %c0_i32 = arith.constant 0 : i32
    %c0_i32_0 = arith.constant 0 : i32
    %c0_i32_1 = arith.constant 0 : i32
    return %arg0, %arg1, %c0_i32, %c0_i32_0 : i32, i32, i32, i32
  }
  func.func @transform_4(%arg0: i32, %arg1: i32) -> (i32, i32, i32, i32) {
    %c0_i32 = arith.constant 0 : i32
    %c0_i32_0 = arith.constant 0 : i32
    %c0_i32_1 = arith.constant 0 : i32
    return %arg0, %arg1, %c0_i32, %c0_i32_0 : i32, i32, i32, i32
  }
}

module attributes {stable_mosaic.version = 11 : i64} {
  func.func @_bn_relu_kernel(%arg0: i32, %arg1: i32, %arg2: memref<1x8x512xf32, #tpu.memory_space<vmem>>, %arg3: memref<8x1xf32, #tpu.memory_space<vmem>>, %arg4: memref<8x1xf32, #tpu.memory_space<vmem>>, %arg5: memref<1x8x512xf32, #tpu.memory_space<vmem>>) attributes {dimension_semantics = [#tpu.dimension_semantics<parallel>, #tpu.dimension_semantics<parallel>], iteration_bounds = array<i64: 4, 1>, scalar_prefetch = 0 : i64, scratch_operands = 0 : i64, tpu.core_type = #tpu.core_type<tc>, window_params = [{transform_indices = @transform_0, window_bounds = array<i64: 1, 8, 512>}, {pipeline_mode = #tpu.pipeline_mode<synchronous>, transform_indices = @transform_1, window_bounds = array<i64: 8, 1>}, {pipeline_mode = #tpu.pipeline_mode<synchronous>, transform_indices = @transform_2, window_bounds = array<i64: 8, 1>}, {transform_indices = @transform_3, window_bounds = array<i64: 1, 8, 512>}]} {
    %c0 = arith.constant 0 : index
    %c0_0 = arith.constant 0 : index
    %c0_1 = arith.constant 0 : index
    %0 = vector.load %arg2[%c0, %c0_0, %c0_1] : memref<1x8x512xf32, #tpu.memory_space<vmem>>, vector<1x8x512xf32>
    %1 = vector.shape_cast %0 : vector<1x8x512xf32> to vector<8x512xf32>
    %c0_2 = arith.constant 0 : index
    %c0_3 = arith.constant 0 : index
    %2 = vector.load %arg3[%c0_2, %c0_3] : memref<8x1xf32, #tpu.memory_space<vmem>>, vector<8x1xf32>
    %3 = vector.broadcast %2 : vector<8x1xf32> to vector<8x512xf32>
    %4 = arith.mulf %1, %3 : vector<8x512xf32>
    %c0_4 = arith.constant 0 : index
    %c0_5 = arith.constant 0 : index
    %5 = vector.load %arg4[%c0_4, %c0_5] : memref<8x1xf32, #tpu.memory_space<vmem>>, vector<8x1xf32>
    %6 = vector.broadcast %5 : vector<8x1xf32> to vector<8x512xf32>
    %7 = arith.addf %4, %6 : vector<8x512xf32>
    %cst = arith.constant 0.000000e+00 : f32
    %8 = vector.broadcast %cst : f32 to vector<8x512xf32>
    %9 = arith.maximumf %7, %8 : vector<8x512xf32>
    %c0_6 = arith.constant 0 : index
    %c0_7 = arith.constant 0 : index
    %c0_8 = arith.constant 0 : index
    %10 = vector.load %arg5[%c0_6, %c0_7, %c0_8] : memref<1x8x512xf32, #tpu.memory_space<vmem>>, vector<1x8x512xf32>
    %11 = vector.shape_cast %10 : vector<1x8x512xf32> to vector<8x512xf32>
    %12 = vector.shape_cast %9 : vector<8x512xf32> to vector<1x8x512xf32>
    tpu.vector_store %arg5[%c0_6, %c0_7, %c0_8], %12 {strides = array<i32>} : memref<1x8x512xf32, #tpu.memory_space<vmem>>, vector<1x8x512xf32>,
    return
  }
  func.func @transform_0(%arg0: i32, %arg1: i32) -> (i32, i32, i32) {
    %c0_i32 = arith.constant 0 : i32
    %c0_i32_0 = arith.constant 0 : i32
    return %arg0, %c0_i32, %arg1 : i32, i32, i32
  }
  func.func @transform_1(%arg0: i32, %arg1: i32) -> (i32, i32) {
    %c0_i32 = arith.constant 0 : i32
    %c0_i32_0 = arith.constant 0 : i32
    %c0_i32_1 = arith.constant 0 : i32
    return %c0_i32, %c0_i32_0 : i32, i32
  }
  func.func @transform_2(%arg0: i32, %arg1: i32) -> (i32, i32) {
    %c0_i32 = arith.constant 0 : i32
    %c0_i32_0 = arith.constant 0 : i32
    %c0_i32_1 = arith.constant 0 : i32
    return %c0_i32, %c0_i32_0 : i32, i32
  }
  func.func @transform_3(%arg0: i32, %arg1: i32) -> (i32, i32, i32) {
    %c0_i32 = arith.constant 0 : i32
    %c0_i32_0 = arith.constant 0 : i32
    return %arg0, %c0_i32, %arg1 : i32, i32, i32
  }
}

</mosaic_0001>

<bundles_post_ra>
// kernel: up_forward.2
= control target key start
LH: loop header
LB: loop body
LE: loop exit
PB: predicated region body
PF: predicated region fallthrough
CT: control target
= control target key end

     0   :  { %s708_s15 = smov 0   ;;  %s710_s16 = smov 0   ;;  %s755_s0 = inlined_call_operand.vmem [shape: bf16[4,16,512], index: 0, kind: input, shape index: {}]   ;;  %s756_s1 = inlined_call_operand.vmem [shape: bf16[4,8,16], index: 1, kind: input, shape index: {}]   ;;  %s757_s2 = inlined_call_operand.vmem [shape: f32[4,8,512], index: 2, kind: output, shape index: {0}]   ;;  %s758_s3 = inlined_call_operand.vmem [shape: f32[4,1,8,1], index: 3, kind: output, shape index: {1}]   ;;  %s759_s4 = inlined_call_operand.vmem [shape: f32[4,1,8,1], index: 4, kind: output, shape index: {2}]  }
   0x1   :  { %s712_s17 = smov 0  }
   0x2 LB: > { %s27_s18 = sadd.s32 1, %s676_s16  ;;  %p609_p0 = scmp.ge.s32.totalorder %s680_s17, 1  ;;  %s680_s17 = sphi %s712_s17, %s15_s17   ;;  %s676_s16 = sphi %s710_s16, %s761_s16   ;;  %s672_s15 = sphi %s708_s15, %s760_s15  }
   0x3   : > { %p29_p1 = scmp.ge.s32.totalorder %s27_s18, 4  ;;  %p201_p2 = scmp.lt.s32.totalorder %s680_s17, 5 }
   0x5   : > { %s763_s18 = smov (%p29_p1, %s27_s18), 0  ;;  %p202_p3 = pnand %p609_p0, %p201_p2 }
   0x6   : > { %p254_p4 = scmp.lt.s32.totalorder (!%p202_p3), %s672_s15, 3  ;;  %v682_v0 = vmov (!%p202_p3), 0   ;;  %vm317_vm0 = vcmask (!%p202_p3), 130048   ;;  %vm412_vm1 = vcmask (!%p202_p3), 7168  }
   0x7   : > { %205 = sbr.rel (%p202_p3) target bundleno = 388 (0x184), region = 28  ;;  %353 = vmatprep.mubr.bf16.mxu0 (!%p202_p3), %v682_v0  ;;  %394 = vmatprep.mubr.bf16.mxu1 (!%p202_p3), %v682_v0 }
   0xe   : > { %s765_s15 = smov (!%p254_p4, %s672_s15), 3 }
   0xf   : > { %s625_s19 = sshll.u32 %s765_s15, 5  ;;  %s612_s20 = sshll.u32 %s765_s15, 2 }
  0x10   : > { %s261_s23 = scalar_lea.vmem %s755_s0, %s625_s19  ;;  %s266_s26 = scalar_lea.vmem %s756_s1, %s612_s20 }
  0x11   : > { %v652_v1 = vld [vmem:[%s261_s23 + $0x4] ss:$16 sps:$4 sm:$0xff]   ;;  %v654_v2 = vld [vmem:[%s261_s23 + $0xc] ss:$16 sps:$4 sm:$0xff]   ;;  %v656_v3 = vld [vmem:[%s261_s23] ss:$16 sps:$4 sm:$0xff]   ;;  %s275_s29 = scalar_lea.vmem %s757_s2, %s625_s19 }
  0x12   : > { %321 = vmatprep.subr.bf16.mxu0 %v652_v1  ;;  %v657_v4 = vld [vmem:[%s261_s23 + $0x8] ss:$16 sps:$4 sm:$0xff]   ;;  %362 = vmatprep.subr.bf16.mxu1 %v654_v2  ;;  %v292_v5 = vld [vmem:[%s266_s26] sm:$0xf]  ;;  %s615_s30 = sshll.u32 %s765_s15, 3 }
  0x13   : > { %322 = vmatpush1.bf16.msra.mxu0 %v656_v3  ;;  %363 = vmatpush1.bf16.msra.mxu1 %v657_v4  ;;  %s283_s7 = scalar_lea.vmem %s758_s3, %s615_s30  ;;  %s290_s10 = scalar_lea.vmem %s759_s4, %s615_s30 }
  0x16   : > { %621 = vmatmul.mubr.msk.bf16.vlgmr.msra.gmra.mrb[0].mxu0 %vm317_vm0, %v292_v5  ;;  %622 = vmatmul.mubr.msk.bf16.vlgmr.msra.gmra.mrb[0].mxu1 %vm317_vm0, %v292_v5 }
  0xe9   : > { %v355_v6 = vpop.f32.mrb[0].mxu0  ;;  %v396_v7 = vpop.f32.mrb[0].mxu1 }
  0xea   : > { %403 = vst [vmem:[%s275_s29] sm:$0xff] %v355_v6  ;;  %v414_v8 = vmul.f32 %v355_v6, %v355_v6  ;;  %405 = vst [vmem:[%s275_s29 + $0x10] sm:$0xff] %v396_v7  ;;  %v357_v9 = vpop.f32.mrb[1].mxu0  ;;  %v398_v10 = vpop.f32.mrb[1].mxu1  ;;  %v416_v11 = vmul.f32 %v396_v7, %v396_v7 }
  0xeb   : > { %404 = vst [vmem:[%s275_s29 + $0x8] sm:$0xff] %v357_v9  ;;  %v407_v12 = vadd.f32 %v357_v9, %v355_v6  ;;  %v415_v13 = vmul.f32 %v357_v9, %v357_v9  ;;  %406 = vst [vmem:[%s275_s29 + $0x18] sm:$0xff] %v398_v10  ;;  %v359_v14 = vpop.f32.mrb[2].mxu0  ;;  %v400_v15 = vpop.f32.mrb[2].mxu1  ;;  %v417_v21 = vmul.f32 %v398_v10, %v398_v10 }
  0xec   : > { %v360_v16 = vpop.f32.mrb[3].mxu0  ;;  %v401_v17 = vpop.f32.mrb[3].mxu1 }
  0xed   : > { %v408_v18 = vadd.f32 %v407_v12, %v396_v7  ;;  %v418_v19 = vadd.f32 %v415_v13, %v414_v8 }
  0xef   : > { %v409_v20 = vadd.f32 %v408_v18, %v398_v10  ;;  %v419_v22 = vadd.f32 %v418_v19, %v416_v11 }
  0xf1   : > { %410 = vadd.xlane.f32.xlu0 %v409_v20  ;;  %v420_v23 = vadd.f32 %v419_v22, %v417_v21 }
  0xf5   : > { %421 = vadd.xlane.f32.xlu0 %v420_v23 }
 0x17e   : > { %v411_v24 = vpop.xlane.xlu0 %410 }
 0x17f   : > { %413 = vst.msk [vmem:[%s283_s7] sm:$0xff] %vm412_vm1, %v411_v24 }
 0x182   : > { %v422_v25 = vpop.xlane.xlu0 %421 }
 0x183   : > { %423 = vst.msk [vmem:[%s290_s10] sm:$0xff] %vm412_vm1, %v422_v25 }
 0x184 PF: > { %s15_s17 = sadd.s32 1, %s680_s17   ;;  %s760_s15 = smov %s676_s16 }
 0x185   : > { %p12_p5 = scmp.ge.s32.totalorder %s15_s17, 6   ;;  %s761_s16 = smov %s763_s18 }
 0x187   :  { %14 = sbr.rel (!%p12_p5) target bundleno = 2 (0x2), region = 85 }

// kernel: up_forward.3
= control target key start
LH: loop header
LB: loop body
LE: loop exit
PB: predicated region body
PF: predicated region fallthrough
CT: control target
= control target key end

     0   :  { %s413_s12 = smov 0   ;;  %s415_s13 = smov 0   ;;  %s452_s0 = inlined_call_operand.vmem [shape: f32[4,8,512], index: 0, kind: input, shape index: {}]   ;;  %s453_s1 = inlined_call_operand.vmem [shape: f32[8,1], index: 1, kind: input, shape index: {}]   ;;  %s454_s2 = inlined_call_operand.vmem [shape: f32[8,1], index: 2, kind: input, shape index: {}]   ;;  %s455_s3 = inlined_call_operand.vmem [shape: f32[4,8,512], index: 3, kind: output, shape index: {}]  }
   0x1   :  { %s417_s14 = smov 0  }
   0x2 LB: > { %s25_s15 = sadd.s32 1, %s386_s13  ;;  %p333_p0 = scmp.ge.s32.totalorder %s390_s14, 1  ;;  %s390_s14 = sphi %s417_s14, %s13_s14   ;;  %s386_s13 = sphi %s415_s13, %s457_s13   ;;  %s382_s12 = sphi %s413_s12, %s456_s12  }
   0x3   : > { %p27_p1 = scmp.ge.s32.totalorder %s25_s15, 4  ;;  %p158_p2 = scmp.lt.s32.totalorder %s390_s14, 5 }
   0x5   : > { %s459_s15 = smov (%p27_p1, %s25_s15), 0  ;;  %p159_p3 = pnand %p333_p0, %p158_p2 }
   0x6   : > { %v214_v0 = vld [vmem:[%s453_s1] sm:$0xff] (!%p159_p3)  ;;  %v392_v1 = vmov (!%p159_p3), 0   ;;  %p191_p4 = scmp.lt.s32.totalorder (!%p159_p3), %s382_s12, 3 }
   0x7   : > { %162 = sbr.rel (%p159_p3) target bundleno = 146 (0x92), region = 32  ;;  %367 = vset.pattern.permute.xlu0 (!%p159_p3), %v392_v1  ;;  %v224_v2 = vld [vmem:[%s454_s2] sm:$0xff] (!%p159_p3) }
   0x8   : > { %217 = vperm.xlu0 (!%p159_p3), %367, %v214_v0  }
   0xc   : > { %227 = vperm.xlu0 (!%p159_p3), %367, %v224_v2  }
   0xe   : > { %s461_s12 = smov (!%p191_p4, %s382_s12), 3 }
   0xf   : > { %s340_s20 = sshll.u32 %s461_s12, 5 }
  0x10   : > { %s198_s23 = scalar_lea.vmem %s452_s0, %s340_s20  ;;  %s208_s26 = scalar_lea.vmem %s455_s3, %s340_s20 }
  0x11   : > { %v210_v3 = vld [vmem:[%s198_s23] sm:$0xff]  ;;  %v211_v5 = vld [vmem:[%s198_s23 + $0x8] sm:$0xff]  ;;  %v212_v6 = vld [vmem:[%s198_s23 + $0x10] sm:$0xff] }
  0x12   : > { %v213_v7 = vld [vmem:[%s198_s23 + $0x18] sm:$0xff] }
  0x87   : > { %v218_v4 = vpop.permute.xlu0 %217 }
  0x88   : > { %v220_v8 = vmul.f32 %v218_v4, %v210_v3  ;;  %v221_v9 = vmul.f32 %v218_v4, %v211_v5  ;;  %v222_v10 = vmul.f32 %v218_v4, %v212_v6  ;;  %v223_v11 = vmul.f32 %v218_v4, %v213_v7 }
  0x8b   : > { %v228_v12 = vpop.permute.xlu0 %227 }
  0x8c   : > { %v230_v13 = vadd.f32 %v228_v12, %v220_v8  ;;  %v231_v14 = vadd.f32 %v228_v12, %v221_v9  ;;  %v232_v15 = vadd.f32 %v228_v12, %v222_v10  ;;  %v233_v16 = vadd.f32 %v228_v12, %v223_v11 }
  0x8e   : > { %v234_v17 = vmax.f32 %v230_v13, 0.0  ;;  %v235_v18 = vmax.f32 %v231_v14, 0.0  ;;  %v236_v19 = vmax.f32 %v232_v15, 0.0  ;;  %v237_v20 = vmax.f32 %v233_v16, 0.0 }
  0x90   : > { %238 = vst [vmem:[%s208_s26] sm:$0xff] %v234_v17  ;;  %239 = vst [vmem:[%s208_s26 + $0x8] sm:$0xff] %v235_v18 }
  0x91   : > { %240 = vst [vmem:[%s208_s26 + $0x10] sm:$0xff] %v236_v19  ;;  %241 = vst [vmem:[%s208_s26 + $0x18] sm:$0xff] %v237_v20 }
  0x92 PF: > { %s13_s14 = sadd.s32 1, %s390_s14   ;;  %s456_s12 = smov %s386_s13 }
  0x93   : > { %p10_p5 = scmp.ge.s32.totalorder %s13_s14, 6   ;;  %s457_s13 = smov %s459_s15 }
  0x95   :  { %12 = sbr.rel (!%p10_p5) target bundleno = 2 (0x2), region = 62 }

</bundles_post_ra>
